<compile_context>
chip_gen: v7x
topology: tpu7x:2x2x1
jax: 0.10.0
libtpu: 0.0.40
codegen_flags: <defaults>
</compile_context>

<pallas_src>
import functools

import jax
import jax.numpy as jnp
from jax import lax
from jax.experimental import pallas as pl
from jax.experimental.pallas import tpu as pltpu


def _round_up(n, m):
    return ((n + m - 1) // m) * m


def _cdiv(a, b):
    return (a + b - 1) // b


def srcritic_kernel(x_ref,
                    w1_ref, b1_ref,
                    w2_ref, b2_ref,
                    w3_ref, b3_ref,
                    w4m_ref, b4m_ref,
                    w4p_ref, b4p_ref,
                    out_ref, *, phi_size: int):
    """One batch tile: neck + head MLP + r/value reductions, packed output.

    Packed output layout (PW = out_ref.shape[-1] = round_up(3*P + 2, 128)):
      lanes [0,   P)   : phi
      lanes [P,  2P)   : sf
      lanes [2P, 3P)   : w
      lane   3P        : r      = sum(phi * w)
      lane   3P + 1    : value  = sum(sf  * w)
      lanes [3P+2, PW) : exact zeros
    """
    dd = w1_ref.dtype                      # matmul operand dtype (bf16)
    f32 = jnp.float32
    x = x_ref[...]                         # [TB, D], already cast to dd

    # ---- neck: tanh(tanh(x W1 + b1) W2 + b2) ----  (accumulate/tanh in f32)
    h1 = jnp.tanh(
        jnp.dot(x, w1_ref[...], preferred_element_type=f32) + b1_ref[...])
    phi = jnp.tanh(
        jnp.dot(h1.astype(dd), w2_ref[...], preferred_element_type=f32)
        + b2_ref[...])                     # [TB, PW], payload in lanes [0, P)

    # ---- head hidden: tanh(phi W3 + b3) ----
    h2 = jnp.tanh(
        jnp.dot(phi.astype(dd), w3_ref[...], preferred_element_type=f32)
        + b3_ref[...])
    h2c = h2.astype(dd)

    pw = out_ref.shape[-1]

    # Single merged N=2*PW head matmul (one MXU pass on v6e/v7x); the sf / w
    # slices below are 128-lane aligned.
    head = jnp.dot(h2c, w4m_ref[...], preferred_element_type=f32) + b4m_ref[...]
    sf = head[:, :pw]                      # payload in lanes [0, P)
    w = head[:, pw:]                       # payload in lanes [0, P)

    # ---- reductions (padded lanes are exact zeros -> sums are exact) ----
    r = jnp.sum(phi * w, axis=-1, keepdims=True)        # [TB, 1]
    value = jnp.sum(sf * w, axis=-1, keepdims=True)     # [TB, 1]

    # "Positioned" head matmul: same column sums as sf/w but written directly
    # into lanes [P,2P) and [2P,3P) of the packed block (bit-identical values,
    # no in-kernel lane shuffle needed).
    pos = jnp.dot(h2c, w4p_ref[...], preferred_element_type=f32) + b4p_ref[...]

    packed = phi + pos                     # disjoint, zero-padded lane ranges
    col = lax.broadcasted_iota(jnp.int32, packed.shape, 1)
    packed = jnp.where(col == 3 * phi_size, r,
                       jnp.where(col == 3 * phi_size + 1, value, packed))

    # One full-width, 128-lane-aligned, unmasked store.
    out_ref[...] = packed


def srcritic_forward(x, params, *, dot_dtype=jnp.bfloat16, batch_tile=1024):
    """x: [B, obs_dim] float32.  params: natural-shape f32 weights ([in, out])."""
    B, D = x.shape
    P = params["w2"].shape[1]
    H = params["w1"].shape[1]             # hidden width (64)
    PW = _round_up(3 * P + 2, 128)        # packed output width (also matmul width)
    f32 = jnp.float32

    def pad_cols(a, n):
        return jnp.pad(a, ((0, 0), (0, n - a.shape[1])))

    def pad_rows(a, n):
        return jnp.pad(a, ((0, n - a.shape[0]), (0, 0)))

    # --- parameter prep (tiny; in production do this once, not per call) ---
    w1 = params["w1"].astype(dot_dtype)
    b1 = params["b1"].astype(f32)
    w2 = pad_cols(params["w2"], PW).astype(dot_dtype)
    b2 = pad_cols(params["b2"], PW).astype(f32)
    w3 = pad_rows(params["w3"], PW).astype(dot_dtype)
    b3 = params["b3"].astype(f32)

    w4_sf, w4_w = params["w4"][:, :P], params["w4"][:, P:]
    b4_sf, b4_w = params["b4"][:, :P], params["b4"][:, P:]

    # Merged head weight [H, 2*PW]: sf in lanes [0,P) of block 0, w in lanes
    # [0,P) of block 1 -> one N=256 matmul, lane-aligned slices in-kernel.
    w4m = (jnp.zeros((H, 2 * PW), f32)
           .at[:, 0:P].set(w4_sf)
           .at[:, PW:PW + P].set(w4_w)).astype(dot_dtype)
    b4m = (jnp.zeros((1, 2 * PW), f32)
           .at[:, 0:P].set(b4_sf)
           .at[:, PW:PW + P].set(b4_w))

    # Positioned head weight [H, PW]: drops sf into lanes [P,2P) and w into
    # lanes [2P,3P) of the packed output block directly.
    w4p = (jnp.zeros((H, PW), f32)
           .at[:, P:2 * P].set(w4_sf)
           .at[:, 2 * P:3 * P].set(w4_w)).astype(dot_dtype)
    b4p = (jnp.zeros((1, PW), f32)
           .at[:, P:2 * P].set(b4_sf)
           .at[:, 2 * P:3 * P].set(b4_w))

    # --- batch tiling: amortize step overhead, keep >=2 steps for v7x's two
    # TensorCores (when B is big enough), minimize dead padded rows. ---
    num_steps = max(_cdiv(B, batch_tile), min(2, _cdiv(B, 16)))
    TB = _round_up(_cdiv(B, num_steps), 16)     # mult of 16: clean bf16 sublanes
    B_pad = _round_up(B, TB)
    grid = (B_pad // TB,)

    xp = x.astype(dot_dtype)
    if B_pad != B:
        xp = jnp.pad(xp, ((0, B_pad - B), (0, 0)))

    def resident(arr):                    # constant index map -> stays in VMEM
        return pl.BlockSpec(arr.shape, lambda i: (0, 0))

    weights = (w1, b1, w2, b2, w3, b3, w4m, b4m, w4p, b4p)
    in_specs = ([pl.BlockSpec((TB, D), lambda i: (i, 0))]
                + [resident(a) for a in weights])
    out_specs = pl.BlockSpec((TB, PW), lambda i: (i, 0))

    # --- VMEM budget: double-buffered x + out tiles, resident weights, margin.
    # Clamp to 48 MiB so the config is safe on v7x (64 MiB physical) while
    # still leaving v5e/v6e (128 MiB) plenty of headroom.
    tile_bytes = TB * D * jnp.dtype(dot_dtype).itemsize + TB * PW * 4
    weight_bytes = sum(int(a.size) * a.dtype.itemsize for a in weights)
    vmem_limit = int(min(max(2 * tile_bytes + 2 * weight_bytes + (4 << 20),
                             8 << 20), 48 << 20))

    slab = pl.pallas_call(
        functools.partial(srcritic_kernel, phi_size=P),
        grid=grid,
        in_specs=in_specs,
        out_specs=out_specs,
        out_shape=jax.ShapeDtypeStruct((B_pad, PW), f32),
        compiler_params=pltpu.CompilerParams(
            dimension_semantics=("parallel",),   # shard batch tiles across TCs (v7x)
            vmem_limit_bytes=vmem_limit,
        ),
    )(xp, *weights)

    # --- unpack the single lane-dense packed block (XLA-side slices) ---
    phi = slab[:B, 0:P]
    sf = slab[:B, P:2 * P]
    w = slab[:B, 2 * P:3 * P]
    r = slab[:B, 3 * P:3 * P + 1]
    value = slab[:B, 3 * P + 1:3 * P + 2]
    return {"phi": phi, "sf": sf, "w": w, "r": r, "value": value}


def init_params(key, obs_dim, phi_size, hidden=64):
    """Synthetic init matching the PyTorch module shapes.

    Weights stored as [in, out] (PyTorch weight transposed); biases [1, out].
    """
    ks = jax.random.split(key, 8)

    def lin(kw, kb, fan_in, fan_out):
        w = jax.random.normal(kw, (fan_in, fan_out), jnp.float32) * jnp.sqrt(2.0 / fan_in)
        b = 0.1 * jax.random.normal(kb, (1, fan_out), jnp.float32)
        return w, b

    w1, b1 = lin(ks[0], ks[1], obs_dim, hidden)        # neck Linear(obs, 64)
    w2, b2 = lin(ks[2], ks[3], hidden, phi_size)       # neck Linear(64, phi)
    w3, b3 = lin(ks[4], ks[5], phi_size, hidden)       # head Linear(phi, 64)
    w4, b4 = lin(ks[6], ks[7], hidden, 2 * phi_size)   # head Linear(64, 2*phi)
    return {"w1": w1, "b1": b1, "w2": w2, "b2": b2,
            "w3": w3, "b3": b3, "w4": w4, "b4": b4}


def srcritic_reference(x, p, dot_dtype=jnp.float32):
    """Plain-JAX reference mirroring the PyTorch forward.

    `dot_dtype` lets the reference apply the same bf16 matmul-operand rounding
    as the kernel's performance configuration (f32 accumulation either way).
    """
    def mm(a, wm):
        return jnp.dot(a.astype(dot_dtype), wm.astype(dot_dtype),
                       preferred_element_type=jnp.float32)

    h1 = jnp.tanh(mm(x, p["w1"]) + p["b1"])
    phi = jnp.tanh(mm(h1, p["w2"]) + p["b2"])
    h2 = jnp.tanh(mm(phi, p["w3"]) + p["b3"])
    out = mm(h2, p["w4"]) + p["b4"]
    P = p["w2"].shape[1]
    sf, w = out[:, :P], out[:, P:]
    r = jnp.sum(phi * w, axis=-1, keepdims=True)
    value = jnp.sum(sf * w, axis=-1, keepdims=True)
    return {"phi": phi, "sf": sf, "w": w, "r": r, "value": value}


if __name__ == "__main__":
    key = jax.random.PRNGKey(0)
    k_param, k_x1, k_x2 = jax.random.split(key, 3)

    obs_dim = 16       # obs_space_shape = (16,)
    phi_size = 8

    params = init_params(k_param, obs_dim, phi_size)

    # Two batch sizes: one non-multiple of 16 (exercises row padding), one
    # spanning multiple grid steps (exercises pipelining / weight residency).
    for k_x, batch in ((k_x1, 37), (k_x2, 300)):
        x = jax.random.normal(k_x, (batch, obs_dim), dtype=jnp.float32)

        out = srcritic_forward(x, params, dot_dtype=jnp.bfloat16)
        jax.block_until_ready(out)

        ref = srcritic_reference(x, params, dot_dtype=jnp.bfloat16)
        for name in ("phi", "sf", "w", "r", "value"):
            assert out[name].shape == ref[name].shape, (name, out[name].shape)
            # Loose-ish tolerance: kernel and XLA reference may round tanh
            # outputs to bf16 slightly differently before the next matmul.
            assert jnp.allclose(out[name], ref[name], atol=2e-2, rtol=2e-2), name

    print("KERNEL_OK")
</pallas_src>

<mosaic_0001>
module attributes {stable_mosaic.version = 11 : i64} {
  func.func @srcritic_kernel(%arg0: i32, %arg1: memref<32x16xbf16, #tpu.memory_space<vmem>>, %arg2: memref<16x64xbf16, #tpu.memory_space<vmem>>, %arg3: memref<1x64xf32, #tpu.memory_space<vmem>>, %arg4: memref<64x128xbf16, #tpu.memory_space<vmem>>, %arg5: memref<1x128xf32, #tpu.memory_space<vmem>>, %arg6: memref<128x64xbf16, #tpu.memory_space<vmem>>, %arg7: memref<1x64xf32, #tpu.memory_space<vmem>>, %arg8: memref<64x256xbf16, #tpu.memory_space<vmem>>, %arg9: memref<1x256xf32, #tpu.memory_space<vmem>>, %arg10: memref<64x128xbf16, #tpu.memory_space<vmem>>, %arg11: memref<1x128xf32, #tpu.memory_space<vmem>>, %arg12: memref<32x128xf32, #tpu.memory_space<vmem>>) attributes {dimension_semantics = [#tpu.dimension_semantics<parallel>], iteration_bounds = array<i64: 2>, scalar_prefetch = 0 : i64, scratch_operands = 0 : i64, tpu.core_type = #tpu.core_type<tc>, window_params = [{transform_indices = @transform_0, window_bounds = array<i64: 32, 16>}, {pipeline_mode = #tpu.pipeline_mode<synchronous>, transform_indices = @transform_1, window_bounds = array<i64: 16, 64>}, {pipeline_mode = #tpu.pipeline_mode<synchronous>, transform_indices = @transform_2, window_bounds = array<i64: 1, 64>}, {pipeline_mode = #tpu.pipeline_mode<synchronous>, transform_indices = @transform_3, window_bounds = array<i64: 64, 128>}, {pipeline_mode = #tpu.pipeline_mode<synchronous>, transform_indices = @transform_4, window_bounds = array<i64: 1, 128>}, {pipeline_mode = #tpu.pipeline_mode<synchronous>, transform_indices = @transform_5, window_bounds = array<i64: 128, 64>}, {pipeline_mode = #tpu.pipeline_mode<synchronous>, transform_indices = @transform_6, window_bounds = array<i64: 1, 64>}, {pipeline_mode = #tpu.pipeline_mode<synchronous>, transform_indices = @transform_7, window_bounds = array<i64: 64, 256>}, {pipeline_mode = #tpu.pipeline_mode<synchronous>, transform_indices = @transform_8, window_bounds = array<i64: 1, 256>}, {pipeline_mode = #tpu.pipeline_mode<synchronous>, transform_indices = @transform_9, window_bounds = array<i64: 64, 128>}, {pipeline_mode = #tpu.pipeline_mode<synchronous>, transform_indices = @transform_10, window_bounds = array<i64: 1, 128>}, {transform_indices = @transform_11, window_bounds = array<i64: 32, 128>}]} {
    %c0 = arith.constant 0 : index
    %c0_0 = arith.constant 0 : index
    %0 = vector.load %arg1[%c0, %c0_0] : memref<32x16xbf16, #tpu.memory_space<vmem>>, vector<32x16xbf16>
    %c0_1 = arith.constant 0 : index
    %c0_2 = arith.constant 0 : index
    %1 = vector.load %arg2[%c0_1, %c0_2] : memref<16x64xbf16, #tpu.memory_space<vmem>>, vector<16x64xbf16>
    %cst = arith.constant dense<0.000000e+00> : vector<32x64xf32>
    %2 = tpu.matmul %0, %1, %cst {dimension_numbers = #tpu.dot_dimension_numbers<[1], [0], [0], [1], [0, 0, 1, 1], [], []>} : vector<32x16xbf16>, vector<16x64xbf16>, vector<32x64xf32> -> vector<32x64xf32>
    %c0_3 = arith.constant 0 : index
    %c0_4 = arith.constant 0 : index
    %3 = vector.load %arg3[%c0_3, %c0_4] : memref<1x64xf32, #tpu.memory_space<vmem>>, vector<1x64xf32>
    %4 = vector.broadcast %3 : vector<1x64xf32> to vector<32x64xf32>
    %5 = arith.addf %2, %4 : vector<32x64xf32>
    %6 = math.tanh %5 : vector<32x64xf32>
    %7 = arith.truncf %6 : vector<32x64xf32> to vector<32x64xbf16>
    %c0_5 = arith.constant 0 : index
    %c0_6 = arith.constant 0 : index
    %8 = vector.load %arg4[%c0_5, %c0_6] : memref<64x128xbf16, #tpu.memory_space<vmem>>, vector<64x128xbf16>
    %cst_7 = arith.constant dense<0.000000e+00> : vector<32x128xf32>
    %9 = tpu.matmul %7, %8, %cst_7 {dimension_numbers = #tpu.dot_dimension_numbers<[1], [0], [0], [1], [0, 0, 1, 1], [], []>} : vector<32x64xbf16>, vector<64x128xbf16>, vector<32x128xf32> -> vector<32x128xf32>
    %c0_8 = arith.constant 0 : index
    %c0_9 = arith.constant 0 : index
    %10 = vector.load %arg5[%c0_8, %c0_9] : memref<1x128xf32, #tpu.memory_space<vmem>>, vector<1x128xf32>
    %11 = vector.broadcast %10 : vector<1x128xf32> to vector<32x128xf32>
    %12 = arith.addf %9, %11 : vector<32x128xf32>
    %13 = math.tanh %12 : vector<32x128xf32>
    %14 = arith.truncf %13 : vector<32x128xf32> to vector<32x128xbf16>
    %c0_10 = arith.constant 0 : index
    %c0_11 = arith.constant 0 : index
    %15 = vector.load %arg6[%c0_10, %c0_11] : memref<128x64xbf16, #tpu.memory_space<vmem>>, vector<128x64xbf16>
    %cst_12 = arith.constant dense<0.000000e+00> : vector<32x64xf32>
    %16 = tpu.matmul %14, %15, %cst_12 {dimension_numbers = #tpu.dot_dimension_numbers<[1], [0], [0], [1], [0, 0, 1, 1], [], []>} : vector<32x128xbf16>, vector<128x64xbf16>, vector<32x64xf32> -> vector<32x64xf32>
    %c0_13 = arith.constant 0 : index
    %c0_14 = arith.constant 0 : index
    %17 = vector.load %arg7[%c0_13, %c0_14] : memref<1x64xf32, #tpu.memory_space<vmem>>, vector<1x64xf32>
    %18 = vector.broadcast %17 : vector<1x64xf32> to vector<32x64xf32>
    %19 = arith.addf %16, %18 : vector<32x64xf32>
    %20 = math.tanh %19 : vector<32x64xf32>
    %21 = arith.truncf %20 : vector<32x64xf32> to vector<32x64xbf16>
    %c0_15 = arith.constant 0 : index
    %c0_16 = arith.constant 0 : index
    %22 = vector.load %arg8[%c0_15, %c0_16] : memref<64x256xbf16, #tpu.memory_space<vmem>>, vector<64x256xbf16>
    %cst_17 = arith.constant dense<0.000000e+00> : vector<32x256xf32>
    %23 = tpu.matmul %21, %22, %cst_17 {dimension_numbers = #tpu.dot_dimension_numbers<[1], [0], [0], [1], [0, 0, 1, 1], [], []>} : vector<32x64xbf16>, vector<64x256xbf16>, vector<32x256xf32> -> vector<32x256xf32>
    %c0_18 = arith.constant 0 : index
    %c0_19 = arith.constant 0 : index
    %24 = vector.load %arg9[%c0_18, %c0_19] : memref<1x256xf32, #tpu.memory_space<vmem>>, vector<1x256xf32>
    %25 = vector.broadcast %24 : vector<1x256xf32> to vector<32x256xf32>
    %26 = arith.addf %23, %25 : vector<32x256xf32>
    %27 = vector.extract_strided_slice %26 {offsets = [0, 0], sizes = [32, 128], strides = [1, 1]} : vector<32x256xf32> to vector<32x128xf32>
    %28 = vector.extract_strided_slice %26 {offsets = [0, 128], sizes = [32, 128], strides = [1, 1]} : vector<32x256xf32> to vector<32x128xf32>
    %29 = arith.mulf %13, %28 : vector<32x128xf32>
    %cst_20 = arith.constant dense<0.000000e+00> : vector<32xf32>
    %30 = vector.multi_reduction <add>, %29, %cst_20 [1] : vector<32x128xf32> to vector<32xf32>
    %31 = vector.shape_cast %30 : vector<32xf32> to vector<32x1xf32>
    %32 = arith.mulf %27, %28 : vector<32x128xf32>
    %cst_21 = arith.constant dense<0.000000e+00> : vector<32xf32>
    %33 = vector.multi_reduction <add>, %32, %cst_21 [1] : vector<32x128xf32> to vector<32xf32>
    %34 = vector.shape_cast %33 : vector<32xf32> to vector<32x1xf32>
    %c0_22 = arith.constant 0 : index
    %c0_23 = arith.constant 0 : index
    %35 = vector.load %arg10[%c0_22, %c0_23] : memref<64x128xbf16, #tpu.memory_space<vmem>>, vector<64x128xbf16>
    %cst_24 = arith.constant dense<0.000000e+00> : vector<32x128xf32>
    %36 = tpu.matmul %21, %35, %cst_24 {dimension_numbers = #tpu.dot_dimension_numbers<[1], [0], [0], [1], [0, 0, 1, 1], [], []>} : vector<32x64xbf16>, vector<64x128xbf16>, vector<32x128xf32> -> vector<32x128xf32>
    %c0_25 = arith.constant 0 : index
    %c0_26 = arith.constant 0 : index
    %37 = vector.load %arg11[%c0_25, %c0_26] : memref<1x128xf32, #tpu.memory_space<vmem>>, vector<1x128xf32>
    %38 = vector.broadcast %37 : vector<1x128xf32> to vector<32x128xf32>
    %39 = arith.addf %36, %38 : vector<32x128xf32>
    %40 = arith.addf %13, %39 : vector<32x128xf32>
    %41 = tpu.iota {dimensions = array<i32: 1>} : vector<32x128xi32>
    %c24_i32 = arith.constant 24 : i32
    %42 = vector.broadcast %c24_i32 : i32 to vector<32x128xi32>
    %43 = arith.cmpi eq, %41, %42 : vector<32x128xi32>
    %c25_i32 = arith.constant 25 : i32
    %44 = vector.broadcast %c25_i32 : i32 to vector<32x128xi32>
    %45 = arith.cmpi eq, %41, %44 : vector<32x128xi32>
    %46 = vector.shape_cast %34 : vector<32x1xf32> to vector<32x1xf32>
    %47 = vector.broadcast %46 : vector<32x1xf32> to vector<32x128xf32>
    %48 = arith.select %45, %47, %40 : vector<32x128xi1>, vector<32x128xf32>
    %49 = vector.shape_cast %31 : vector<32x1xf32> to vector<32x1xf32>
    %50 = vector.broadcast %49 : vector<32x1xf32> to vector<32x128xf32>
    %51 = arith.select %43, %50, %48 : vector<32x128xi1>, vector<32x128xf32>
    %c0_27 = arith.constant 0 : index
    %c0_28 = arith.constant 0 : index
    %52 = vector.load %arg12[%c0_27, %c0_28] : memref<32x128xf32, #tpu.memory_space<vmem>>, vector<32x128xf32>
    tpu.vector_store %arg12[%c0_27, %c0_28], %51 {strides = array<i32>} : memref<32x128xf32, #tpu.memory_space<vmem>>, vector<32x128xf32>,
    return
  }
  func.func @transform_0(%arg0: i32) -> (i32, i32) {
    %c0_i32 = arith.constant 0 : i32
    %c0_i32_0 = arith.constant 0 : i32
    return %arg0, %c0_i32 : i32, i32
  }
  func.func @transform_1(%arg0: i32) -> (i32, i32) {
    %c0_i32 = arith.constant 0 : i32
    %c0_i32_0 = arith.constant 0 : i32
    %c0_i32_1 = arith.constant 0 : i32
    return %c0_i32, %c0_i32_0 : i32, i32
  }
  func.func @transform_2(%arg0: i32) -> (i32, i32) {
    %c0_i32 = arith.constant 0 : i32
    %c0_i32_0 = arith.constant 0 : i32
    %c0_i32_1 = arith.constant 0 : i32
    return %c0_i32, %c0_i32_0 : i32, i32
  }
  func.func @transform_3(%arg0: i32) -> (i32, i32) {
    %c0_i32 = arith.constant 0 : i32
    %c0_i32_0 = arith.constant 0 : i32
    %c0_i32_1 = arith.constant 0 : i32
    return %c0_i32, %c0_i32_0 : i32, i32
  }
  func.func @transform_4(%arg0: i32) -> (i32, i32) {
    %c0_i32 = arith.constant 0 : i32
    %c0_i32_0 = arith.constant 0 : i32
    %c0_i32_1 = arith.constant 0 : i32
    return %c0_i32, %c0_i32_0 : i32, i32
  }
  func.func @transform_5(%arg0: i32) -> (i32, i32) {
    %c0_i32 = arith.constant 0 : i32
    %c0_i32_0 = arith.constant 0 : i32
    %c0_i32_1 = arith.constant 0 : i32
    return %c0_i32, %c0_i32_0 : i32, i32
  }
  func.func @transform_6(%arg0: i32) -> (i32, i32) {
    %c0_i32 = arith.constant 0 : i32
    %c0_i32_0 = arith.constant 0 : i32
    %c0_i32_1 = arith.constant 0 : i32
    return %c0_i32, %c0_i32_0 : i32, i32
  }
  func.func @transform_7(%arg0: i32) -> (i32, i32) {
    %c0_i32 = arith.constant 0 : i32
    %c0_i32_0 = arith.constant 0 : i32
    %c0_i32_1 = arith.constant 0 : i32
    return %c0_i32, %c0_i32_0 : i32, i32
  }
  func.func @transform_8(%arg0: i32) -> (i32, i32) {
    %c0_i32 = arith.constant 0 : i32
    %c0_i32_0 = arith.constant 0 : i32
    %c0_i32_1 = arith.constant 0 : i32
    return %c0_i32, %c0_i32_0 : i32, i32
  }
  func.func @transform_9(%arg0: i32) -> (i32, i32) {
    %c0_i32 = arith.constant 0 : i32
    %c0_i32_0 = arith.constant 0 : i32
    %c0_i32_1 = arith.constant 0 : i32
    return %c0_i32, %c0_i32_0 : i32, i32
  }
  func.func @transform_10(%arg0: i32) -> (i32, i32) {
    %c0_i32 = arith.constant 0 : i32
    %c0_i32_0 = arith.constant 0 : i32
    %c0_i32_1 = arith.constant 0 : i32
    return %c0_i32, %c0_i32_0 : i32, i32
  }
  func.func @transform_11(%arg0: i32) -> (i32, i32) {
    %c0_i32 = arith.constant 0 : i32
    %c0_i32_0 = arith.constant 0 : i32
    return %arg0, %c0_i32 : i32, i32
  }
}

</mosaic_0001>

<bundles_post_ra>
// kernel: tpu_custom_call.1
= control target key start
LH: loop header
LB: loop body
LE: loop exit
PB: predicated region body
PF: predicated region fallthrough
CT: control target
= control target key end

     0   :  { %s1994_s0 = inlined_call_operand.vmem [shape: bf16[64,16], index: 0, kind: input, shape index: {}]   ;;  %s1995_s1 = inlined_call_operand.hbm [shape: bf16[16,64], index: 1, kind: input, shape index: {}]   ;;  %s1996_s2 = inlined_call_operand.hbm [shape: f32[1,64], index: 2, kind: input, shape index: {}]   ;;  %s1997_s3 = inlined_call_operand.vmem [shape: bf16[64,128], index: 3, kind: input, shape index: {}]   ;;  %s1998_s4 = inlined_call_operand.hbm [shape: f32[1,128], index: 4, kind: input, shape index: {}]   ;;  %s1999_s5 = inlined_call_operand.vmem [shape: bf16[128,64], index: 5, kind: input, shape index: {}]   ;;  %s2000_s6 = inlined_call_operand.hbm [shape: f32[1,64], index: 6, kind: input, shape index: {}]   ;;  %s2001_s7 = inlined_call_operand.vmem [shape: bf16[64,256], index: 7, kind: input, shape index: {}]   ;;  %s2002_s8 = inlined_call_operand.vmem [shape: f32[1,256], index: 8, kind: input, shape index: {}]   ;;  %s2003_s9 = inlined_call_operand.vmem [shape: bf16[64,128], index: 9, kind: input, shape index: {}]   ;;  %s2004_s10 = inlined_call_operand.vmem [shape: f32[1,128], index: 10, kind: input, shape index: {}]   ;;  %s2005_s11 = inlined_call_operand.hbm [shape: f32[64,128], index: 11, kind: output, shape index: {}]  }
   0x1   :  { %2014 = sst [smem:[#allocation20_spill]] %s1996_s2 }
   0x2   :  { %16 = vsyncpa [#allocation3], 0 }
   0x3   :  { %17 = vsyncpa [#allocation6], 0 }
   0x4   :  { %18 = vsyncpa [#allocation9], 0 }
   0x5   :  { %19 = vsyncpa [#allocation4], 0 }
   0x6   :  { %21 = vsyncpa [#allocation4 + $0x1], 0  ;;  %s1661_s17 = smov 0   ;;  %s1663_s18 = smov 0  }
   0x7   :  { %s1665_s19 = smov 0   ;;  %s1667_s20 = smov 0  }
   0x8 LB: > { %2015 = sst [smem:[#allocation15_spill]] %s1577_s17  ;;  %s1682_s21 = sadd.s32 4294967295, %s1589_s20   ;;  %s1589_s20 = sphi %s1667_s20, %s2037_s20   ;;  %s1585_s19 = sphi %s1665_s19, %s2039_s19   ;;  %s1581_s18 = sphi %s1663_s18, %s2041_s18   ;;  %s1577_s17 = sphi %s1661_s17, %s2040_s17  }
   0x9   : > { %2016 = sst [smem:[#allocation16_spill]] %s1585_s19  ;;  %s1128_s22 = sadd.s32 4294967294, %s1589_s20  }
   0xa   : > { %s1686_s23 = sadd.s32 1, %s1589_s20   ;;  %s270_s24 = sadd.s32 1, %s1585_s19 }
   0xb   : > { %2017 = sst [smem:[#allocation17_spill]] %s1686_s23  ;;  %s267_s25 = ssub.s32 %s1589_s20, %s1686_s23 }
   0xc   : > { %p280_p0 = scmp.ne.s32.totalorder %s1585_s19, %s1581_s18  ;;  %p268_p1 = scmp.eq.s32.totalorder %s267_s25, 0 }
   0xd   : > { %p281_p2 = scmp.eq.s32.totalorder %s1682_s21, 1  ;;  %p286_p3 = scmp.ne.s32.totalorder %s1581_s18, %s1577_s17 }
   0xe   : > { %p287_p4 = scmp.eq.s32.totalorder %s1128_s22, 1  ;;  %p1129_p7 = scmp.ge.s32.totalorder %s1589_s20, 1 }
   0xf   : > { %s1697_s26 = scalar_select %p268_p1, %s1585_s19, %s270_s24  }
  0x10   : > { %p1699_p5 = por %p281_p2, %p280_p0  ;;  %p1703_p6 = por %p287_p4, %p286_p3 }
  0x11   : > { %2018 = sst [smem:[#allocation18_spill]] %s1697_s26  ;;  %p294_p8 = scmp.lt.s32.totalorder %s1589_s20, 3 }
  0x12   : > { %s2019_s27 = scalar_select %p1699_p5, 1, 0 }
  0x13   : > { %s2020_s28 = scalar_select %p1703_p6, 1, 0 }
  0x14   : > { %p2009_p9 = scmp.eq.s32.totalorder %s1682_s21, 0  ;;  %p1710_p10 = pnand %p1129_p7, %p294_p8 }
  0x15   : > { %2021 = sst [smem:[#allocation19_spill]] %s2020_s28  ;;  %s1591_s30 = smov [#allocation5]  }
  0x16   : > { %s2022_s29 = scalar_select %p1710_p10, 1, 0 }
  0x17   : > { %s320_s12 = sshll.u32 %s1591_s30, 4  ;;  %p1281_p11 = pneg %p1710_p10  ;;  %s321_s12 = int_to_ptr.vmem [resolvable:$true] %s320_s12 }
  0x18   : > { %s1592_s13 = smov [#allocation2]   ;;  %s1593_s16 = smov [#allocation7]  }
  0x19   : > { %s306_s14 = sshll.u32 %s1592_s13, 4  ;;  %p1718_p12 = pnand %p2009_p9, %p1281_p11  ;;  %s1722_s14 = int_to_ptr.vmem [resolvable:$true] %s306_s14 }
  0x1a   : > { %s1724_s22 = sshll.u32 %s1593_s16, 4  ;;  %s2024_s2 = sld [smem:[#allocation20_spill]]  ;;  %s335_s22 = int_to_ptr.vmem [resolvable:$true] %s1724_s22 }
  0x1b   : > { %p1734_p0 = pneg %p1718_p12 }
  0x20   : > { %s1403_s30 = scalar_lea.hbm %s2024_s2, 16 }
  0x21   : > { %p1404_p13 = scmp.ne.s32.totalorder %s2024_s2, %s1403_s30  ;;  %p1410_p3 = scmp.lt.u32.totalorder %s1403_s30, %s2024_s2 }
  0x23   : > { %p1406_p1 = pnand %p1734_p0, %p1404_p13 }
  0x25   : > { %p1407_p2 = pneg %p1406_p1 }
  0x27   : > { %p1412_p4 = pnand %p1410_p3, %p1407_p2 }
  0x29   : > { %1415 = shalt.err (!%p1412_p4)
}
  0x2a   : > { %s1416_s24 = scalar_lea.vmem %s321_s12, 16  ;;  %s1423_s19 = scalar_lea.vmem %s321_s12, 32 }
  0x2b   : > { %p1417_p7 = scmp.ne.s32.totalorder %s321_s12, %s1416_s24  ;;  %p1424_p9 = scmp.lt.s32.totalorder %s321_s12, %s321_s12 }
  0x2c   : > { %p1425_p6 = scmp.lt.s32.totalorder %s1423_s19, %s1416_s24 }
  0x2d   : > { %p1419_p8 = pnand %p1417_p7, %p1734_p0 }
  0x2e   : > { %p1426_p5 = por %p1425_p6, %p1424_p9 }
  0x2f   : > { %p1420_p11 = pneg %p1419_p8 }
  0x31   : > { %p1427_p10 = pnand %p1426_p5, %p1420_p11 }
  0x33   : > { %1430 = shalt.err (!%p1427_p10)
}
  0x34   : > { %1287 = dma.hbm_to_vmem [thread:$0]  (!%p1718_p12), %s2024_s2, 16, %s321_s12, [#allocation6]  }
  0x35   : > { %s1431_s16 = scalar_lea.hbm %s1995_s1, 128 }
  0x36   : > { %p1432_p13 = scmp.ne.s32.totalorder %s1995_s1, %s1431_s16  ;;  %p1438_p5 = scmp.lt.u32.totalorder %s1431_s16, %s1995_s1 }
  0x38   : > { %p1434_p1 = pnand %p1432_p13, %p1734_p0 }
  0x3a   : > { %p1435_p6 = pneg %p1434_p1 }
  0x3c   : > { %p1440_p9 = pnand %p1438_p5, %p1435_p6 }
  0x3e   : > { %1443 = shalt.err (!%p1440_p9)
}
  0x3f   : > { %s1444_s12 = scalar_lea.vmem %s1722_s14, 128  ;;  %p1452_p4 = scmp.lt.s32.totalorder %s1722_s14, %s1722_s14 }
  0x40   : > { %p1445_p10 = scmp.ne.s32.totalorder %s1722_s14, %s1444_s12  ;;  %p1453_p7 = scmp.lt.s32.totalorder %s1444_s12, %s1444_s12 }
  0x42   : > { %p1447_p2 = pnand %p1445_p10, %p1734_p0  ;;  %p1454_p8 = por %p1453_p7, %p1452_p4 }
  0x44   : > { %p1448_p3 = pneg %p1447_p2 }
  0x46   : > { %p1455_p11 = pnand %p1454_p8, %p1448_p3 }
  0x48   : > { %1458 = shalt.err (!%p1455_p11)
}
  0x49   : > { %s1594_s17 = smov 64   ;;  %s1595_s28 = smov 4  }
  0x4a   : > { %1284 = dma.hbm_to_vmem [thread:$0]  (!%p1718_p12), %s1995_s1, 128, %s1722_s14, [#allocation3], %s1594_s17, %s1594_s17, %s1595_s28  }
  0x4b   : > { %s1459_s16 = scalar_lea.hbm %s1998_s4, 16 }
  0x4c   : > { %p1460_p13 = scmp.ne.s32.totalorder %s1998_s4, %s1459_s16  ;;  %p1466_p5 = scmp.lt.u32.totalorder %s1459_s16, %s1998_s4 }
  0x4e   : > { %p1462_p1 = pnand %p1460_p13, %p1734_p0 }
  0x50   : > { %p1463_p6 = pneg %p1462_p1 }
  0x52   : > { %p1468_p9 = pnand %p1466_p5, %p1463_p6 }
  0x54   : > { %1471 = shalt.err (!%p1468_p9)
}
  0x55   : > { %s1472_s26 = scalar_lea.vmem %s335_s22, 16  ;;  %s1479_s14 = scalar_lea.vmem %s335_s22, 32 }
  0x56   : > { %p1473_p10 = scmp.ne.s32.totalorder %s335_s22, %s1472_s26  ;;  %p1480_p4 = scmp.lt.s32.totalorder %s335_s22, %s335_s22 }
  0x57   : > { %p1481_p7 = scmp.lt.s32.totalorder %s1479_s14, %s1472_s26 }
  0x58   : > { %p1475_p2 = pnand %p1473_p10, %p1734_p0 }
  0x59   : > { %p1482_p8 = por %p1481_p7, %p1480_p4 }
  0x5a   : > { %p1476_p3 = pneg %p1475_p2 }
  0x5c   : > { %p1483_p11 = pnand %p1482_p8, %p1476_p3 }
  0x5e   : > { %1486 = shalt.err (!%p1483_p11)
}
  0x5f   : > { %1290 = dma.hbm_to_vmem [thread:$0]  (!%p1718_p12), %s1998_s4, 16, %s335_s22, [#allocation6]  }
  0x60   : > { %s1596_s2 = smov [#allocation8]   ;;  %s1487_s16 = scalar_lea.hbm %s2000_s6, 16 }
  0x61   : > { %s348_s25 = sshll.u32 %s1596_s2, 4  ;;  %p1488_p13 = scmp.ne.s32.totalorder %s2000_s6, %s1487_s16  ;;  %s349_s25 = int_to_ptr.vmem [resolvable:$true] %s348_s25 }
  0x62   : > { %p1494_p5 = scmp.lt.u32.totalorder %s1487_s16, %s2000_s6 }
  0x63   : > { %p1490_p1 = pnand %p1488_p13, %p1734_p0 }
  0x65   : > { %p1491_p6 = pneg %p1490_p1 }
  0x67   : > { %p1496_p9 = pnand %p1494_p5, %p1491_p6 }
  0x69   : > { %1499 = shalt.err (!%p1496_p9)
}
  0x6a   : > { %s1500_s22 = scalar_lea.vmem %s349_s25, 16  ;;  %s1507_s14 = scalar_lea.vmem %s349_s25, 32 }
  0x6b   : > { %p1501_p10 = scmp.ne.s32.totalorder %s349_s25, %s1500_s22  ;;  %p1508_p4 = scmp.lt.s32.totalorder %s349_s25, %s349_s25 }
  0x6c   : > { %p1509_p7 = scmp.lt.s32.totalorder %s1507_s14, %s1500_s22 }
  0x6d   : > { %p1503_p2 = pnand %p1501_p10, %p1734_p0 }
  0x6e   : > { %p1510_p8 = por %p1509_p7, %p1508_p4 }
  0x6f   : > { %p1504_p3 = pneg %p1503_p2 }
  0x71   : > { %p1511_p11 = pnand %p1510_p8, %p1504_p3 }
  0x73   : > { %1514 = shalt.err (!%p1511_p11)
}
  0x74   : > { %1293 = dma.hbm_to_vmem [thread:$0]  (!%p1718_p12), %s2000_s6, 16, %s349_s25, [#allocation9]  }
  0x75   : > { %p2026_p13 = scmp.ne.s32.totalorder %s2022_s29, 0 }
  0x76   : > { %p2027_p1 = scmp.eq.s32.totalorder (!%p2026_p13), %s1682_s21, 0 }
  0x77   : > { %382 = sbr.rel (%p2026_p13) target bundleno = 1225 (0x4c9), region = 64 }
  0x7e   : > { %1560 = dma.done.wait (%p2027_p1), [#allocation3], 128   ;;  %p2028_p0 = pmov %p2027_p1 }
  0x80   : > { %1562 = vsyncadd (%p2028_p0), [#allocation3], 4294967168  ;;  %p2029_p6 = pmov %p2028_p0 }
  0x81   : > { %p2030_p5 = pmov %p2028_p0 }
  0x82   : > { %1564 = dma.done.wait (%p2029_p6), [#allocation6], 32  }
  0x83   : > { %1566 = vsyncadd (%p2030_p5), [#allocation6], 4294967264  ;;  %p2031_p9 = pmov %p2028_p0 }
  0x84   : > { %p2032_p12 = pmov %p2028_p0 }
  0x85   : > { %1568 = dma.done.wait (%p2031_p9), [#allocation9], 16  }
  0x86   : > { %1570 = vsyncadd (%p2032_p12), [#allocation9], 4294967280  ;;  %s1141_s29 = sshll.u32 %s1682_s21, 2  ;;  %v1348_v0 = vld [vmem:[#allocation2] sm:$0xff]   ;;  %vm471_vm0 = vcmask 130048   ;;  %v1352_v4 = vld [vmem:[%s1997_s3 + $0x8] sm:$0xff]  }
  0x87   : > { %p435_p10 = scmp.lt.s32.totalorder %s1141_s29, 7  ;;  %1213 = vmatprep.subr.bf16.mxu0 %v1348_v0  ;;  %v1351_v3 = vld [vmem:[%s1997_s3] sm:$0xff]   ;;  %v1353_v5 = vld [vmem:[%s1997_s3 + $0x10] sm:$0xff]   ;;  %v1354_v6 = vld [vmem:[%s1997_s3 + $0x18] sm:$0xff]   ;;  %vm572_vm1 = vcmask 523264   ;;  %v1597_v51 = vmov 0  }
  0x88   : > { %1214 = vmatpush3.bf16.msra.mxu0 %v1348_v0  ;;  %1219 = vmatprep.subr.bf16.mxu1 %v1351_v3  ;;  %v1355_v7 = vld [vmem:[%s1999_s5] sm:$0xff]   ;;  %v1356_v8 = vld [vmem:[%s1999_s5 + $0x8] sm:$0xff]   ;;  %v1357_v9 = vld [vmem:[%s1999_s5 + $0x10] sm:$0xff]   ;;  %s431_s19 = sand.u32 1, %s1581_s18   ;;  %s1187_s14 = sshll.u32 %s1682_s21, 9 }
  0x89   : > { %s2043_s29 = smov (!%p435_p10, %s1141_s29), 7  ;;  %1220 = vmatpush3.bf16.msra.mxu1 %v1351_v3  ;;  %1231 = vmatprep.subr.bf16.mxu0 %v1355_v7  ;;  %v1143_v10 = vld [vmem:[#allocation5] ss:$0 sm:$0xff]  ;;  %v1358_v25 = vld [vmem:[%s1999_s5 + $0x18] sm:$0xff]   ;;  %v1359_v26 = vld [vmem:[%s1999_s5 + $0x20] sm:$0xff]   ;;  %s1140_s12 = sshll.u32 %s431_s19, 5 }
  0x8a   : > { %s1142_s15 = sshll.u32 %s2043_s29, 2  ;;  %1221 = vmatprep.subr.bf16.mxu1 %v1352_v4  ;;  %v1360_v27 = vld [vmem:[%s1999_s5 + $0x28] sm:$0xff]   ;;  %v1361_v28 = vld [vmem:[%s1999_s5 + $0x30] sm:$0xff]   ;;  %v1362_v29 = vld [vmem:[%s1999_s5 + $0x38] sm:$0xff]   ;;  %s433_s26 = scalar_lea.vmem [#allocation10], %s1140_s12 }
  0x8b   : > { %s438_s25 = scalar_lea.vmem %s1994_s0, %s1142_s15  ;;  %v1149_v30 = vld [vmem:[#allocation7] ss:$0 sm:$0xff]  ;;  %v1365_v45 = vld [vmem:[%s2001_s7 + $0x4] ss:$8 sps:$4 sm:$0xff]   ;;  %v1368_v47 = vld [vmem:[%s2001_s7 + $0x14] ss:$8 sps:$4 sm:$0xff]   ;;  %s1947_s29 = scalar_lea.hbm %s2005_s11, %s1187_s14 }
  0x8c   : > { %v1349_v1 = vld [vmem:[%s438_s25] sm:$0xff]   ;;  %v1350_v2 = vld [vmem:[%s438_s25 + $0x8] sm:$0xff]   ;;  %v1366_v48 = vld [vmem:[%s2001_s7 + $0x10] ss:$8 sps:$4 sm:$0xff]   ;;  %s1025_s22 = sshll.u32 %s433_s26, 4  ;;  %s1953_s21 = scalar_lea.sflag [#allocation4], %s431_s19  ;;  %s1942_s22 = int_to_ptr.vmem [resolvable:$true] %s1025_s22 }
  0x8d   : > { %1215 = vmatprep.mubr.msk.bf16.mxu0 %vm471_vm0, %v1349_v1  ;;  %1222 = vmatpush3.bf16.msra.mxu1 %v1352_v4  ;;  %v1363_v46 = vld [vmem:[%s2001_s7] ss:$8 sps:$4 sm:$0xff]   ;;  %v1371_v49 = vld [vmem:[%s2001_s7 + $0x24] ss:$8 sps:$4 sm:$0xff]   ;;  %v1374_v52 = vld [vmem:[%s2001_s7 + $0x34] ss:$8 sps:$4 sm:$0xff]  }
  0x8e   : > { %1216 = vmatmul.mubr.msk.bf16.vlgmr.msra.gmra.mrb[0].mxu0 %vm471_vm0, %v1350_v2  ;;  %1223 = vmatprep.subr.bf16.mxu1 %v1353_v5  ;;  %v1369_v50 = vld [vmem:[%s2001_s7 + $0x20] ss:$8 sps:$4 sm:$0xff]   ;;  %v1372_v53 = vld [vmem:[%s2001_s7 + $0x30] ss:$8 sps:$4 sm:$0xff]   ;;  %v1156_v55 = vld [vmem:[#allocation8] ss:$0 sm:$0xff] }
  0x8f   : > { %1232 = vmatpush3.bf16.msra.mxu0 %v1355_v7  ;;  %v1375_v54 = vld [vmem:[%s2003_s9] sm:$0xff]   ;;  %v1377_v7 = vld [vmem:[%s2003_s9 + $0x10] sm:$0xff]   ;;  %s1515_s15 = scalar_lea.vmem %s1942_s22, 512  ;;  %p2033_p3 = scmp.ne.s32.totalorder %s2019_s27, 0 }
  0x90   : > { %1233 = vmatprep.subr.bf16.mxu0 %v1356_v8  ;;  %p1516_p2 = scmp.ne.s32.totalorder %s1942_s22, %s1515_s15  ;;  %s1598_s13 = smov [#allocation10]  }
  0x91   : > { %1224 = vmatpush3.bf16.msra.mxu1 %v1353_v5  ;;  %s1519_s2 = sshll.u32 %s1598_s13, 4  ;;  %s1520_s2 = int_to_ptr.vmem [resolvable:$false] %s1519_s2 }
  0x92   : > { %1225 = vmatprep.subr.bf16.mxu1 %v1354_v6  ;;  %p1517_p4 = pnand %p1516_p2, %p2033_p3  ;;  %s1521_s25 = scalar_lea.vmem %s1520_s2, 1024 }
  0x93   : > { %1234 = vmatpush3.bf16.msra.mxu0 %v1356_v8  ;;  %v1378_v8 = vld [vmem:[%s2003_s9 + $0x18] sm:$0xff]   ;;  %p1522_p8 = scmp.lt.s32.totalorder %s1942_s22, %s1520_s2  ;;  %p1523_p11 = scmp.lt.s32.totalorder %s1521_s25, %s1515_s15 }
  0x94   : > { %1235 = vmatprep.subr.bf16.mxu0 %v1357_v9  ;;  %p1518_p7 = pneg %p1517_p4 }
  0x95   : > { %1226 = vmatpush3.bf16.msra.mxu1 %v1354_v6  ;;  %v1376_v6 = vld [vmem:[%s2003_s9 + $0x8] sm:$0xff]   ;;  %p1524_p13 = por %p1523_p11, %p1522_p8 }
  0x96   : > { %826 = vmatprep.subr.bf16.mxu1 %v1365_v45 }
  0x97   : > { %1236 = vmatpush3.bf16.msra.mxu0 %v1357_v9  ;;  %v770_v9 = vlaneseq  ;;  %p1525_p1 = pnand %p1524_p13, %p1518_p7 }
  0x98   : > { %1237 = vmatprep.subr.bf16.mxu0 %v1358_v25 }
  0x9b   : > { %1238 = vmatpush3.bf16.msra.mxu0 %v1358_v25 }
  0x9c   : > { %1239 = vmatprep.subr.bf16.mxu0 %v1359_v26 }
  0x9f   : > { %1240 = vmatpush3.bf16.msra.mxu0 %v1359_v26 }
  0xa0   : > { %1241 = vmatprep.subr.bf16.mxu0 %v1360_v27 }
  0xa3   : > { %1242 = vmatpush3.bf16.msra.mxu0 %v1360_v27 }
  0xa4   : > { %1243 = vmatprep.subr.bf16.mxu0 %v1361_v28 }
  0xa7   : > { %1244 = vmatpush3.bf16.msra.mxu0 %v1361_v28 }
  0xa8   : > { %1245 = vmatprep.subr.bf16.mxu0 %v1362_v29 }
  0xab   : > { %1246 = vmatpush3.bf16.msra.mxu0 %v1362_v29 }
 0x161   : > { %v1217_v11 = vpop.f32.mrb[0].mxu0 }
 0x162   : > { %v521_v12 = vadd.f32 %v1217_v11, %v1143_v10  ;;  %v512_v13 = vpop.f32.mrb[1].mxu0 }
 0x163   : > { %v513_v14 = vadd.f32 %v1143_v10, %v512_v13  ;;  %v1218_v15 = vpop.f32.mrb[2].mxu0 }
 0x164   : > { %1379 = vtanh.f32 %v521_v12  ;;  %v524_v16 = vadd.f32 %v1218_v15, %v1143_v10  ;;  %v515_v17 = vpop.f32.mrb[3].mxu0  ;;  %v768_v12 = vld [vmem:[%s2002_s8] sm:$0x3] }
 0x165   : > { %1381 = vtanh.f32 %v513_v14  ;;  %v516_v18 = vadd.f32 %v1143_v10, %v515_v17  ;;  %v771_v10 = vshrl.u32 %v770_v9, 7 }
 0x166   : > { %1383 = vtanh.f32 %v524_v16 }
 0x167   : > { %1385 = vtanh.f32 %v516_v18  ;;  %v772_v11 = vsub.s32 0, %v771_v10  ;;  %v776_v13 = vsub.s32 1, %v771_v10 }
 0x169   : > { %v773_v14 = vrot.slane %v768_v12, %v772_v11  ;;  %v777_v15 = vrot.slane %v768_v12, %v776_v13 }
 0x16e   : > { %v1380_v19 = vpop.eup %1379 }
 0x16f   : > { %v1382_v20 = vpop.eup %1381 }
 0x170   : > { %v1384_v21 = vpop.eup %1383 }
 0x171   : > { %v1386_v22 = vpop.eup %1385  ;;  %v532_v23 = vpack.c.bf16 %v1384_v21, %v1380_v19 }
 0x172   : > { %v531_v24 = vpack.c.bf16 %v1386_v22, %v1382_v20 }
 0x174   : > { %1227 = vmatprep.mubr.msk.bf16.mxu1 %vm572_vm1, %v531_v24 }
 0x175   : > { %1228 = vmatmul.mubr.msk.bf16.vlgmr.msra.gmra.mrb[0].mxu1 %vm572_vm1, %v532_v23 }
 0x176   : > { %827 = vmatpush1.bf16.msra.mxu1 %v1363_v46  ;;  %858 = vmatprep.mubr.bf16.mxu1 %v1597_v51 }
 0x177   : > { %828 = vmatprep.subr.bf16.mxu1 %v1368_v47 }
 0x17a   : > { %829 = vmatpush1.bf16.msra.mxu1 %v1366_v48  ;;  %v1175_v48 = vld [vmem:[%s2004_s10] ss:$0 sm:$0xff] }
 0x17b   : > { %830 = vmatprep.subr.bf16.mxu1 %v1371_v49  ;;  %v996_v49 = vand.u32 127, %v770_v9 }
 0x17d   : > { %vm998_vm2 = vcmp.eq.s32.totalorder %v996_v49, 25  ;;  %vm997_vm3 = vcmp.eq.s32.totalorder %v996_v49, 24 }
 0x17e   : > { %831 = vmatpush1.bf16.msra.mxu1 %v1369_v50 }
 0x17f   : > { %832 = vmatprep.subr.bf16.mxu1 %v1374_v52 }
 0x182   : > { %833 = vmatpush1.bf16.msra.mxu1 %v1372_v53 }
 0x183   : > { %1251 = vmatprep.subr.bf16.mxu1 %v1375_v54 }
 0x248   : > { %v1229_v31 = vpop.f32.mrb[0].mxu1 }
 0x249   : > { %v613_v32 = vpop.f32.mrb[1].mxu1  ;;  %v622_v35 = vadd.f32 %v1229_v31, %v1149_v30 }
 0x24a   : > { %v614_v33 = vadd.f32 %v1149_v30, %v613_v32  ;;  %v1230_v34 = vpop.f32.mrb[2].mxu1 }
 0x24b   : > { %v625_v36 = vadd.f32 %v1230_v34, %v1149_v30  ;;  %v616_v37 = vpop.f32.mrb[3].mxu1 }
 0x24c   : > { %1387 = vtanh.f32 %v614_v33  ;;  %v617_v38 = vadd.f32 %v1149_v30, %v616_v37 }
 0x24d   : > { %1389 = vtanh.f32 %v625_v36 }
 0x24e   : > { %1391 = vtanh.f32 %v617_v38 }
 0x24f   : > { %1393 = vtanh.f32 %v622_v35 }
 0x256   : > { %v1866_v39 = vpop.eup %1387 }
 0x257   : > { %v1868_v40 = vpop.eup %1389 }
 0x258   : > { %v1870_v41 = vpop.eup %1391 }
 0x259   : > { %v1872_v42 = vpop.eup %1393  ;;  %v632_v43 = vpack.c.bf16 %v1870_v41, %v1866_v39 }
 0x25a   : > { %v633_v44 = vpack.c.bf16 %v1868_v40, %v1872_v42 }
 0x25b   : > { %1247 = vmatprep.mubr.bf16.mxu0 %v632_v43 }
 0x25c   : > { %1248 = vmatmul.mubr.bf16.vlgmr.msra.gmra.mrb[4].mxu0 %v633_v44 }
 0x32f   : > { %v1249_v56 = vpop.f32.mrb[4].mxu0 }
 0x330   : > { %v748_v57 = vadd.f32 %v1249_v56, %v1156_v55  ;;  %v739_v58 = vpop.f32.mrb[5].mxu0 }
 0x331   : > { %v740_v59 = vadd.f32 %v1156_v55, %v739_v58  ;;  %v1250_v60 = vpop.f32.mrb[6].mxu0 }
 0x332   : > { %1395 = vtanh.f32 %v748_v57  ;;  %v751_v61 = vadd.f32 %v1250_v60, %v1156_v55  ;;  %v742_v62 = vpop.f32.mrb[7].mxu0 }
 0x333   : > { %1397 = vtanh.f32 %v740_v59  ;;  %v743_v63 = vadd.f32 %v1156_v55, %v742_v62 }
 0x334   : > { %1399 = vtanh.f32 %v751_v61 }
 0x335   : > { %1401 = vtanh.f32 %v743_v63 }
 0x33c   : > { %v1396_v0 = vpop.eup %1395 }
 0x33d   : > { %v1398_v1 = vpop.eup %1397 }
 0x33e   : > { %v1400_v2 = vpop.eup %1399 }
 0x33f   : > { %v1402_v3 = vpop.eup %1401  ;;  %v759_v4 = vpack.c.bf16 %v1400_v2, %v1396_v0 }
 0x340   : > { %v758_v5 = vpack.c.bf16 %v1402_v3, %v1398_v1 }
 0x342   : > { %1173 = vmatmul.mubr.msk.bf16.vlgmr.msra.gmra.mrb[4].mxu1 %vm572_vm1, %v758_v5 }
 0x343   : > { %1252 = vmatpush3.bf16.msra.mxu1 %v1375_v54  ;;  %868 = vmatprep.mubr.bf16.mxu1 %v1597_v51 }
 0x344   : > { %1253 = vmatprep.subr.bf16.mxu1 %v1376_v6 }
 0x347   : > { %1254 = vmatpush3.bf16.msra.mxu1 %v1376_v6 }
 0x348   : > { %1255 = vmatprep.subr.bf16.mxu1 %v1377_v7 }
 0x34a   : > { %1174 = vmatmul.mubr.msk.bf16.gmra.mrb[8].mxu1 %vm572_vm1, %v759_v4 }
 0x34b   : > { %1256 = vmatpush3.bf16.msra.mxu1 %v1377_v7  ;;  %1259 = vmatprep.mubr.msk.bf16.mxu1 %vm572_vm1, %v758_v5 }
 0x34c   : > { %1257 = vmatprep.subr.bf16.mxu1 %v1378_v8 }
 0x34f   : > { %1258 = vmatpush3.bf16.msra.mxu1 %v1378_v8 }
 0x352   : > { %1260 = vmatmul.mubr.msk.bf16.vlgmr.msra.gmra.mrb[12].mxu1 %vm572_vm1, %v759_v4 }
 0x415   : > { %v860_v16 = vpop.f32.mrb[4].mxu1 }
 0x416   : > { %v861_v17 = vadd.f32 %v860_v16, %v773_v14  ;;  %v862_v18 = vpop.f32.mrb[5].mxu1 }
 0x417   : > { %v863_v19 = vadd.f32 %v862_v18, %v777_v15  ;;  %v864_v20 = vpop.f32.mrb[6].mxu1 }
 0x418   : > { %v865_v21 = vadd.f32 %v864_v20, %v773_v14  ;;  %v866_v22 = vpop.f32.mrb[7].mxu1 }
 0x419   : > { %v867_v23 = vadd.f32 %v866_v22, %v777_v15  ;;  %v891_v24 = vmul.f32 %v863_v19, %v861_v17  ;;  %v879_v28 = vmul.f32 %v1866_v39, %v863_v19 }
 0x41b   : > { %895 = vadd.xlane.f32.xlu0 %v891_v24  ;;  %v880_v25 = vmul.f32 %v1870_v41, %v867_v23  ;;  %v892_v26 = vmul.f32 %v867_v23, %v865_v21 }
 0x41d   : > { %v870_v27 = vpop.f32.mrb[8].mxu1  ;;  %885 = vadd.xlane.f32.xlu1 %v880_v25 }
 0x41e   : > { %v871_v29 = vadd.f32 %v870_v27, %v773_v14  ;;  %v872_v30 = vpop.f32.mrb[9].mxu1 }
 0x41f   : > { %v873_v31 = vadd.f32 %v872_v30, %v777_v15  ;;  %v874_v32 = vpop.f32.mrb[10].mxu1  ;;  %883 = vadd.xlane.f32.xlu0 %v879_v28 }
 0x420   : > { %v875_v33 = vadd.f32 %v874_v32, %v773_v14  ;;  %v876_v34 = vpop.f32.mrb[11].mxu1 }
 0x421   : > { %v877_v35 = vadd.f32 %v876_v34, %v777_v15  ;;  %v893_v36 = vmul.f32 %v873_v31, %v871_v29  ;;  %v881_v43 = vmul.f32 %v1872_v42, %v873_v31 }
 0x423   : > { %899 = vadd.xlane.f32.xlu1 %v893_v36  ;;  %897 = vadd.xlane.f32.xlu0 %v892_v26  ;;  %v894_v37 = vmul.f32 %v877_v35, %v875_v33  ;;  %v882_v47 = vmul.f32 %v1868_v40, %v877_v35 }
 0x425   : > { %v1261_v38 = vpop.f32.mrb[12].mxu1 }
 0x426   : > { %v976_v44 = vpop.f32.mrb[13].mxu1  ;;  %v985_v58 = vadd.f32 %v1261_v38, %v1175_v48 }
 0x427   : > { %v1262_v45 = vpop.f32.mrb[14].mxu1  ;;  %901 = vadd.xlane.f32.xlu1 %v894_v37  ;;  %887 = vadd.xlane.f32.xlu0 %v881_v43  ;;  %v977_v50 = vadd.f32 %v1175_v48, %v976_v44 }
 0x428   : > { %v979_v46 = vpop.f32.mrb[15].mxu1  ;;  %v988_v63 = vadd.f32 %v1262_v45, %v1175_v48 }
 0x429   : > { %v991_v52 = vadd.f32 %v1866_v39, %v977_v50  ;;  %v980_v53 = vadd.f32 %v1175_v48, %v979_v46  ;;  %v993_v39 = vadd.f32 %v1872_v42, %v985_v58 }
 0x42a   : > { %v994_v4 = vadd.f32 %v1868_v40, %v988_v63 }
 0x42b   : > { %889 = vadd.xlane.f32.xlu1 %v882_v47  ;;  %v992_v59 = vadd.f32 %v1870_v41, %v980_v53 }
 0x4a8   : > { %v896_v51 = vpop.xlane.xlu0 %895 }
 0x4a9   : > { %v999_v54 = vsel %vm998_vm2, %v896_v51, %v991_v52 }
 0x4aa   : > { %v886_v55 = vpop.xlane.xlu1 %885 }
 0x4ac   : > { %v884_v56 = vpop.xlane.xlu0 %883 }
 0x4ad   : > { %v1003_v57 = vsel %vm997_vm3, %v884_v56, %v999_v54 }
 0x4ae   : > { %1007 = vst [vmem:[%s433_s26] sm:$0xff] %v1003_v57 }
 0x4b0   : > { %v900_v60 = vpop.xlane.xlu1 %899  ;;  %v898_v61 = vpop.xlane.xlu0 %897 }
 0x4b1   : > { %v1000_v62 = vsel %vm998_vm2, %v898_v61, %v992_v59  ;;  %v1001_v1 = vsel %vm998_vm2, %v900_v60, %v993_v39 }
 0x4b2   : > { %v1004_v0 = vsel %vm997_vm3, %v886_v55, %v1000_v62 }
 0x4b3   : > { %1008 = vst [vmem:[%s433_s26 + $0x8] sm:$0xff] %v1004_v0 }
 0x4b4   : > { %v902_v2 = vpop.xlane.xlu1 %901  ;;  %v888_v3 = vpop.xlane.xlu0 %887 }
 0x4b5   : > { %v1005_v41 = vsel %vm997_vm3, %v888_v3, %v1001_v1  ;;  %v1002_v42 = vsel %vm998_vm2, %v902_v2, %v994_v4 }
 0x4b6   : > { %1009 = vst [vmem:[%s433_s26 + $0x10] sm:$0xff] %v1005_v41 }
 0x4b8   : > { %v890_v5 = vpop.xlane.xlu1 %889 }
 0x4b9   : > { %v1006_v6 = vsel %vm997_vm3, %v890_v5, %v1002_v42 }
 0x4ba   : > { %1010 = vst [vmem:[%s433_s26 + $0x18] sm:$0xff] %v1006_v6 }
 0x4bb   : > { %1528 = shalt.err (!%p1525_p1)
}
 0x4bc   : > { %s1529_s23 = scalar_lea.hbm %s1947_s29, 512  ;;  %s1533_s24 = scalar_lea.hbm %s2005_s11, 1024 }
 0x4bd   : > { %p1530_p0 = scmp.ne.s32.totalorder %s1947_s29, %s1529_s23  ;;  %p1534_p9 = scmp.lt.u32.totalorder %s1947_s29, %s2005_s11 }
 0x4be   : > { %p1535_p12 = scmp.lt.u32.totalorder %s1533_s24, %s1529_s23  ;;  %p1537_p2 = scmp.lt.u32.totalorder %s1529_s23, %s1947_s29 }
 0x4bf   : > { %p1531_p6 = pnand %p1530_p0, %p2033_p3 }
 0x4c0   : > { %p1536_p10 = por %p1535_p12, %p1534_p9 }
 0x4c1   : > { %p1532_p5 = pneg %p1531_p6 }
 0x4c2   : > { %p1538_p4 = por %p1537_p2, %p1536_p10 }
 0x4c4   : > { %p1539_p7 = pnand %p1538_p4, %p1532_p5 }
 0x4c6   : > { %1542 = shalt.err (!%p1539_p7)
}
 0x4c7   : > { %s1599_s26 = smov 128   ;;  %s1600_s14 = smov 8  }
 0x4c8   : > { %1279 = dma.vmem_to_hbm [thread:$0]  (%p2033_p3), %s1942_s22, 512, %s1947_s29, %s1953_s21, %s1599_s26, %s1599_s26, %s1600_s14  }
 0x4c9 PF: > { %s2034_s17 = sld [smem:[#allocation15_spill]]  ;;  %s2035_s28 = sld [smem:[#allocation19_spill]] }
 0x4ca   : > { %p1306_p8 = scmp.ge.s32.totalorder %s1589_s20, 2 }
 0x4cf   : > { %s1040_s15 = sand.u32 1, %s2034_s17   ;;  %p2036_p11 = scmp.ne.s32.totalorder %s2035_s28, 0 }
 0x4d0   : > { %s1041_s13 = scalar_lea.sflag [#allocation4], %s1040_s15 }
 0x4d1   : > { %p1295_p13 = pnand %p1306_p8, %p2036_p11 }
 0x4d3   : > { %1572 = dma.done.wait (!%p1295_p13), %s1041_s13, 512  }
 0x4d4   : > { %1574 = vsyncadd (!%p1295_p13), %s1041_s13, 4294966784  ;;  %s2037_s20 = sld [smem:[#allocation17_spill]]  ;;  %s2038_s2 = sld [smem:[#allocation16_spill]] }
 0x4d5   : > { %s2039_s19 = sld [smem:[#allocation18_spill]]  ;;  %s2040_s17 = smov %s1581_s18 }
 0x4da   : > { %p24_p1 = scmp.ge.s32.totalorder %s2037_s20, 4   ;;  %s2041_s18 = smov %s2038_s2 }
 0x4dc   :  { %26 = sbr.rel (!%p24_p1) target bundleno = 8 (0x8), region = 116 }
 0x4e3   :  { %1046 = vsyncpa [#allocation3], 1 }
 0x4e4   :  { %1048 = vsyncpa [#allocation3 + $0x1], 1 }
 0x4e5   :  { %1049 = vsyncpa [#allocation6], 1 }
 0x4e6   :  { %1050 = vsyncpa [#allocation9], 1 }
 0x4e7   :  { %1051 = vsyncpa [#allocation4], 1 }
 0x4e8   :  { %1053 = vsyncpa [#allocation4 + $0x1], 1 }

</bundles_post_ra>
